<compile_context>
chip_gen: v5e
topology: v5e:2x2
jax: 0.10.0
libtpu: 0.0.40
codegen_flags: <defaults>
</compile_context>

<pallas_src>
import jax
import jax.numpy as jnp
from jax.experimental import pallas as pl
from jax.experimental.pallas import tpu as pltpu


def _round_up(n, m):
    return ((n + m - 1) // m) * m


def _rnn_kernel(n_act_ref, emb_ref, len_ref, wx_ref, bx_ref, uh_ref,
                wfc_ref, bfc_ref, out_ref, gates_sc, h_sc):
    Tc, Bblk, Ep = emb_ref.shape
    Hp = uh_ref.shape[0]
    t_chunk = pl.program_id(1)

    # Reset the carried hidden state at the first time-chunk of each batch block.
    @pl.when(t_chunk == 0)
    def _init():
        h_sc[...] = jnp.zeros_like(h_sc)

    # Skip chunks entirely past max(lengths) (PyTorch lengths.max() semantics).
    @pl.when(t_chunk < n_act_ref[0])
    def _chunk():
        # (1) Fused input-to-hidden path for the whole chunk: one MXU matmul
        #     (Tc*Bblk, Ep) @ (Ep, 2*Hp) with f32 accumulation, written
        #     directly into the gate scratch (no full-size temp + copy pass).
        emb2d = emb_ref[...].reshape(Tc * Bblk, Ep)
        gates_sc[...] = (
            jnp.dot(emb2d, wx_ref[...], preferred_element_type=jnp.float32)
            + bx_ref[...]
        ).astype(gates_sc.dtype)
        # R_t = sigmoid(W_r x_t + b): gate half, in place (independent of h).
        gates_sc[:, pl.ds(Hp, Hp)] = jax.nn.sigmoid(
            gates_sc[:, pl.ds(Hp, Hp)].astype(jnp.float32)
        ).astype(gates_sc.dtype)

        lengths = len_ref[...]              # (Bblk, 1) int32
        uh = uh_ref[...]                    # f32, read once; RHS stays resident
        t0 = t_chunk * Tc

        # (2) Serial recurrence; h carried in vregs, Tc fully unrolled so the
        #     next step's gate-row loads / compare / select issue under the
        #     current step's MXU + EUP latency.
        def step(i, h):
            row = pl.ds(pl.multiple_of(i * Bblk, Bblk), Bblk)
            a = gates_sc[row, pl.ds(0, Hp)].astype(jnp.float32)
            r = gates_sc[row, pl.ds(Hp, Hp)].astype(jnp.float32)
            h_hat = jnp.tanh(a + jnp.dot(h, uh,
                                         preferred_element_type=jnp.float32))
            return jnp.where(lengths > t0 + i, h_hat * r, h)

        h_sc[...] = jax.lax.fori_loop(0, Tc, step, h_sc[...], unroll=True)

    # (3) Final FC projection, once per batch block; Cp multiple of 128 ->
    #     lane-dense store.
    @pl.when(t_chunk == pl.num_programs(1) - 1)
    def _final():
        out_ref[...] = (
            jnp.dot(h_sc[...], wfc_ref[...], preferred_element_type=jnp.float32)
            + bfc_ref[...]
        ).astype(out_ref.dtype)


def flow_control_rnn_forward(x, lengths, params, *, compute_dtype=jnp.float32,
                             t_chunk=8, batch_blocks=1, pad_idx=1):
    """x: (B, T) int32 token ids; lengths: (B,) int32.  Returns (B, C) f32 logits.

    batch_blocks: independent batch blocks along the 'parallel' grid axis.
    Use 2 on v7x (2 TensorCores/chip); keep 1 on single-TC v5e/v6e so the
    serial recurrence is not replayed per block on one core.
    """
    B, T = x.shape
    emb_table = params["embedding"]
    V, E = emb_table.shape
    H = params["w_h"].shape[1]
    C = params["w_fc"].shape[1]

    cd = jnp.dtype(compute_dtype)
    b_align = 16 if cd == jnp.dtype(jnp.bfloat16) else 8   # bf16 min LHS tile
    Bblk = _round_up(-(-B // batch_blocks), b_align)
    Bp = Bblk * batch_blocks
    Tc = int(t_chunk)
    Tp = _round_up(T, Tc)
    n_chunks = Tp // Tc
    Ep = _round_up(E, 128)
    Hp = _round_up(H, 128)
    Cp = _round_up(C, 128)

    # Pad/cast the embedding table ONCE; the gather then directly produces the
    # padded, time-major, compute-dtype stream (no extra pad/cast/transpose
    # passes over the (T, B, E) activation stream in HBM).
    table_p = jnp.pad(emb_table.astype(cd), ((0, 0), (0, Ep - E)))
    x_p = jnp.full((Bp, Tp), int(pad_idx) % V, jnp.int32).at[:B, :T].set(
        x.astype(jnp.int32))
    emb = table_p[x_p.T]                                   # (Tp, Bp, Ep)
    # TODO(synk): for very long T, gather per-chunk inside the kernel via
    # scalar-prefetched token ids + per-row DMA to avoid materializing (Tp,Bp,Ep).

    # Fused input-to-hidden weight [W_h | W_r] (compute dtype) and pre-summed
    # f32 biases.  U_h / W_fc stay f32 (tiny; avoids recurrent requantization).
    wx = jnp.zeros((Ep, 2 * Hp), cd)
    wx = wx.at[:E, :H].set(params["w_h"].astype(cd))
    wx = wx.at[:E, Hp:Hp + H].set(params["w_r"].astype(cd))
    bx = jnp.zeros((1, 2 * Hp), jnp.float32)
    bx = bx.at[0, :H].set(params["b_wh"] + params["b_h"])
    bx = bx.at[0, Hp:Hp + H].set(params["b_wr"] + params["b_r"])
    uh = jnp.zeros((Hp, Hp), jnp.float32).at[:H, :H].set(params["u_h"])
    wfc = jnp.zeros((Hp, Cp), jnp.float32).at[:H, :C].set(params["w_fc"])
    bfc = jnp.zeros((1, Cp), jnp.float32).at[0, :C].set(params["b_fc"])

    len_col = jnp.zeros((Bp, 1), jnp.int32).at[:B, 0].set(
        lengths.astype(jnp.int32))                          # padded rows: len 0

    # Number of active time chunks = ceil(max(lengths) / Tc), scalar-prefetched.
    n_act = jnp.clip((jnp.max(len_col) + Tc - 1) // Tc, 1, n_chunks)
    n_act = n_act.astype(jnp.int32).reshape(1)

    # VMEM budget sized to the actual resident buffers, with headroom.
    act = cd.itemsize
    resident = (2 * Tc * Bblk * Ep * act                    # double-buffered emb chunk
                + Tc * Bblk * 2 * Hp * act                  # gate scratch
                + 2 * (Ep * 2 * Hp * act + Hp * Hp * 4 + Hp * Cp * 4
                       + 2 * Hp * 4 + Cp * 4 + Bblk * 4)    # weights / biases / lens
                + Bblk * Hp * 4                             # hidden state
                + 2 * Bblk * Cp * 4)                        # output block
    vmem_limit = int(min(max(2 * resident + (4 << 20), 16 << 20), 64 << 20))

    out = pl.pallas_call(
        _rnn_kernel,
        out_shape=jax.ShapeDtypeStruct((Bp, Cp), jnp.float32),
        grid_spec=pltpu.PrefetchScalarGridSpec(
            num_scalar_prefetch=1,
            grid=(batch_blocks, n_chunks),
            in_specs=[
                # dead chunks repeat the last live block -> no DMA issued
                pl.BlockSpec((Tc, Bblk, Ep),
                             lambda b, t, na: (jnp.minimum(t, na[0] - 1), b, 0)),
                pl.BlockSpec((Bblk, 1), lambda b, t, na: (b, 0)),
                pl.BlockSpec((Ep, 2 * Hp), lambda b, t, na: (0, 0)),
                pl.BlockSpec((1, 2 * Hp), lambda b, t, na: (0, 0)),
                pl.BlockSpec((Hp, Hp), lambda b, t, na: (0, 0)),
                pl.BlockSpec((Hp, Cp), lambda b, t, na: (0, 0)),
                pl.BlockSpec((1, Cp), lambda b, t, na: (0, 0)),
            ],
            out_specs=pl.BlockSpec((Bblk, Cp), lambda b, t, na: (b, 0)),
            scratch_shapes=[
                pltpu.VMEM((Tc * Bblk, 2 * Hp), cd),   # [W_h x + b | sigmoid(W_r x + b)]
                pltpu.VMEM((Bblk, Hp), jnp.float32),   # hidden state, persists over chunks
            ],
        ),
        compiler_params=pltpu.CompilerParams(
            dimension_semantics=("parallel", "arbitrary"),
            vmem_limit_bytes=vmem_limit,
        ),
    )(n_act, emb, len_col, wx, bx, uh, wfc, bfc)

    return out[:B, :C]


def _reference_forward(x, lengths, params):
    """Pure-JAX f32 reference mirroring the PyTorch semantics."""
    emb = params["embedding"][x]                    # (B, T, E)
    B, T, _ = emb.shape
    H = params["w_h"].shape[1]
    h = jnp.zeros((B, H), jnp.float32)
    for i in range(T):
        m = (i < lengths).astype(jnp.float32)[:, None]
        x_t = emb[:, i, :]
        h_hat = jnp.tanh(x_t @ params["w_h"] + params["b_wh"]
                         + h @ params["u_h"] + params["b_h"])
        r = jax.nn.sigmoid(x_t @ params["w_r"] + params["b_wr"] + params["b_r"])
        h = m * (h_hat * r) + (1.0 - m) * h
    return h @ params["w_fc"] + params["b_fc"]


def init_params(key, vocab_size, embed_dim, hidden_dim, num_classes, pad_idx=1):
    ks = jax.random.split(key, 8)
    scale = 0.1
    emb = scale * jax.random.normal(ks[0], (vocab_size, embed_dim), jnp.float32)
    emb = emb.at[pad_idx].set(0.0)                  # padding_idx row = 0
    return {
        "embedding": emb,
        "w_h": scale * jax.random.normal(ks[1], (embed_dim, hidden_dim), jnp.float32),
        "b_wh": scale * jax.random.normal(ks[2], (hidden_dim,), jnp.float32),
        "u_h": scale * jax.random.normal(ks[3], (hidden_dim, hidden_dim), jnp.float32),
        "b_h": jnp.zeros((hidden_dim,), jnp.float32),
        "w_r": scale * jax.random.normal(ks[4], (embed_dim, hidden_dim), jnp.float32),
        "b_wr": scale * jax.random.normal(ks[5], (hidden_dim,), jnp.float32),
        "b_r": jnp.zeros((hidden_dim,), jnp.float32),
        "w_fc": scale * jax.random.normal(ks[6], (hidden_dim, num_classes), jnp.float32),
        "b_fc": scale * jax.random.normal(ks[7], (num_classes,), jnp.float32),
    }


if __name__ == "__main__":
    key = jax.random.PRNGKey(0)
    vocab_size, embed_dim, hidden_dim, num_classes, pad_idx = 50, 16, 32, 8, 1
    B, T = 5, 20

    k_p, k_x, k_l = jax.random.split(key, 3)
    params = init_params(k_p, vocab_size, embed_dim, hidden_dim, num_classes, pad_idx)

    lengths = jax.random.randint(k_l, (B,), 1, T + 1).astype(jnp.int32)
    x = jax.random.randint(k_x, (B, T), 0, vocab_size).astype(jnp.int32)
    # pad tokens beyond each sequence's length (padded-batch convention)
    x = jnp.where(jnp.arange(T)[None, :] < lengths[:, None], x, pad_idx)

    fwd = jax.jit(flow_control_rnn_forward,
                  static_argnames=("compute_dtype", "t_chunk", "batch_blocks", "pad_idx"))

    ref = _reference_forward(x, lengths, params)

    # f32 path: multi-chunk time grid, tight correctness check.
    logits = jax.block_until_ready(fwd(x, lengths, params))
    assert logits.shape == (B, num_classes)
    assert jnp.allclose(logits, ref, atol=1e-4, rtol=1e-4), "f32 mismatch vs reference"

    # f32 path with 2 batch blocks (v7x megacore layout) and a smaller chunk.
    logits_mc = jax.block_until_ready(
        fwd(x, lengths, params, t_chunk=4, batch_blocks=2))
    assert jnp.allclose(logits_mc, ref, atol=1e-4, rtol=1e-4), "megacore mismatch"

    # bf16 production path (emb / W_h|W_r in bf16; U_h, W_fc, state stay f32).
    logits_bf16 = jax.block_until_ready(
        fwd(x, lengths, params, compute_dtype=jnp.bfloat16))
    assert jnp.allclose(logits_bf16, ref, atol=5e-2), "bf16 mismatch vs reference"

    print("KERNEL_OK")
</pallas_src>

<mosaic_0001>
module attributes {stable_mosaic.version = 11 : i64} {
  func.func @_rnn_kernel(%arg0: i32, %arg1: i32, %arg2: memref<1xi32, #tpu.memory_space<smem>>, %arg3: memref<8x8x128xf32, #tpu.memory_space<vmem>>, %arg4: memref<8x1xi32, #tpu.memory_space<vmem>>, %arg5: memref<128x256xf32, #tpu.memory_space<vmem>>, %arg6: memref<1x256xf32, #tpu.memory_space<vmem>>, %arg7: memref<128x128xf32, #tpu.memory_space<vmem>>, %arg8: memref<128x128xf32, #tpu.memory_space<vmem>>, %arg9: memref<1x128xf32, #tpu.memory_space<vmem>>, %arg10: memref<8x128xf32, #tpu.memory_space<vmem>>, %arg11: memref<64x256xf32, #tpu.memory_space<vmem>>, %arg12: memref<8x128xf32, #tpu.memory_space<vmem>>) attributes {dimension_semantics = [#tpu.dimension_semantics<parallel>, #tpu.dimension_semantics<arbitrary>], iteration_bounds = array<i64: 1, 3>, scalar_prefetch = 1 : i64, scratch_operands = 2 : i64, tpu.core_type = #tpu.core_type<tc>, window_params = [{transform_indices = @transform_0, window_bounds = array<i64: 8, 8, 128>}, {transform_indices = @transform_1, window_bounds = array<i64: 8, 1>}, {pipeline_mode = #tpu.pipeline_mode<synchronous>, transform_indices = @transform_2, window_bounds = array<i64: 128, 256>}, {pipeline_mode = #tpu.pipeline_mode<synchronous>, transform_indices = @transform_3, window_bounds = array<i64: 1, 256>}, {pipeline_mode = #tpu.pipeline_mode<synchronous>, transform_indices = @transform_4, window_bounds = array<i64: 128, 128>}, {pipeline_mode = #tpu.pipeline_mode<synchronous>, transform_indices = @transform_5, window_bounds = array<i64: 128, 128>}, {pipeline_mode = #tpu.pipeline_mode<synchronous>, transform_indices = @transform_6, window_bounds = array<i64: 1, 128>}, {transform_indices = @transform_7, window_bounds = array<i64: 8, 128>}]} {
    %c0_i32 = arith.constant 0 : i32
    %0 = arith.cmpi eq, %arg1, %c0_i32 : i32
    %1 = arith.extui %0 : i1 to i32
    %c0_i32_0 = arith.constant 0 : i32
    %2 = arith.cmpi ne, %1, %c0_i32_0 : i32
    scf.if %2 {
      %cst = arith.constant 0.000000e+00 : f32
      %10 = vector.broadcast %cst : f32 to vector<8x128xf32>
      %c0_3 = arith.constant 0 : index
      %c0_4 = arith.constant 0 : index
      %11 = vector.load %arg12[%c0_3, %c0_4] : memref<8x128xf32, #tpu.memory_space<vmem>>, vector<8x128xf32>
      tpu.vector_store %arg12[%c0_3, %c0_4], %10 {strides = array<i32>} : memref<8x128xf32, #tpu.memory_space<vmem>>, vector<8x128xf32>,
    } else {
    }
    %c0 = arith.constant 0 : index
    %3 = memref.load %arg2[%c0] : memref<1xi32, #tpu.memory_space<smem>>
    %4 = arith.cmpi slt, %arg1, %3 : i32
    %5 = arith.extui %4 : i1 to i32
    %c0_i32_1 = arith.constant 0 : i32
    %6 = arith.cmpi ne, %5, %c0_i32_1 : i32
    scf.if %6 {
      %c0_3 = arith.constant 0 : index
      %c0_4 = arith.constant 0 : index
      %c0_5 = arith.constant 0 : index
      %10 = vector.load %arg3[%c0_3, %c0_4, %c0_5] : memref<8x8x128xf32, #tpu.memory_space<vmem>>, vector<8x8x128xf32>
      %11 = vector.shape_cast %10 : vector<8x8x128xf32> to vector<64x128xf32>
      %c0_6 = arith.constant 0 : index
      %c0_7 = arith.constant 0 : index
      %12 = vector.load %arg5[%c0_6, %c0_7] : memref<128x256xf32, #tpu.memory_space<vmem>>, vector<128x256xf32>
      %cst = arith.constant dense<0.000000e+00> : vector<64x256xf32>
      %13 = tpu.matmul %11, %12, %cst {dimension_numbers = #tpu.dot_dimension_numbers<[1], [0], [0], [1], [0, 0, 1, 1], [], []>} : vector<64x128xf32>, vector<128x256xf32>, vector<64x256xf32> -> vector<64x256xf32>
      %c0_8 = arith.constant 0 : index
      %c0_9 = arith.constant 0 : index
      %14 = vector.load %arg6[%c0_8, %c0_9] : memref<1x256xf32, #tpu.memory_space<vmem>>, vector<1x256xf32>
      %15 = vector.broadcast %14 : vector<1x256xf32> to vector<64x256xf32>
      %16 = arith.addf %13, %15 : vector<64x256xf32>
      %c0_10 = arith.constant 0 : index
      %c0_11 = arith.constant 0 : index
      %17 = vector.load %arg11[%c0_10, %c0_11] : memref<64x256xf32, #tpu.memory_space<vmem>>, vector<64x256xf32>
      tpu.vector_store %arg11[%c0_10, %c0_11], %16 {strides = array<i32>} : memref<64x256xf32, #tpu.memory_space<vmem>>, vector<64x256xf32>,
      %c0_12 = arith.constant 0 : index
      %c128 = arith.constant 128 : index
      %18 = vector.load %arg11[%c0_12, %c128] : memref<64x256xf32, #tpu.memory_space<vmem>>, vector<64x128xf32>
      %19 = arith.negf %18 : vector<64x128xf32>
      %20 = math.exp %19 : vector<64x128xf32>
      %cst_13 = arith.constant 1.000000e+00 : f32
      %21 = vector.broadcast %cst_13 : f32 to vector<64x128xf32>
      %22 = arith.addf %21, %20 : vector<64x128xf32>
      %23 = arith.divf %21, %22 : vector<64x128xf32>
      %c0_14 = arith.constant 0 : index
      %c128_15 = arith.constant 128 : index
      %24 = vector.load %arg11[%c0_14, %c128_15] : memref<64x256xf32, #tpu.memory_space<vmem>>, vector<64x128xf32>
      tpu.vector_store %arg11[%c0_14, %c128_15], %23 {strides = array<i32>} : memref<64x256xf32, #tpu.memory_space<vmem>>, vector<64x128xf32>,
      %c0_16 = arith.constant 0 : index
      %c0_17 = arith.constant 0 : index
      %25 = vector.load %arg4[%c0_16, %c0_17] : memref<8x1xi32, #tpu.memory_space<vmem>>, vector<8x1xi32>
      %c0_18 = arith.constant 0 : index
      %c0_19 = arith.constant 0 : index
      %26 = vector.load %arg7[%c0_18, %c0_19] : memref<128x128xf32, #tpu.memory_space<vmem>>, vector<128x128xf32>
      %c8_i32 = arith.constant 8 : i32
      %27 = arith.muli %arg1, %c8_i32 : i32
      %c0_20 = arith.constant 0 : index
      %c0_21 = arith.constant 0 : index
      %28 = vector.load %arg12[%c0_20, %c0_21] : memref<8x128xf32, #tpu.memory_space<vmem>>, vector<8x128xf32>
      %c0_i32_22 = arith.constant 0 : i32
      %c8_i32_23 = arith.constant 8 : i32
      %29 = arith.muli %c0_i32_22, %c8_i32_23 : i32
      %30 = tpu.assume_multiple %29, 8 : i32
      %31 = arith.index_cast %30 : i32 to index
      %c0_24 = arith.constant 0 : index
      %32 = vector.load %arg11[%31, %c0_24] : memref<64x256xf32, #tpu.memory_space<vmem>>, vector<8x128xf32>
      %33 = arith.index_cast %30 : i32 to index
      %c128_25 = arith.constant 128 : index
      %34 = vector.load %arg11[%33, %c128_25] : memref<64x256xf32, #tpu.memory_space<vmem>>, vector<8x128xf32>
      %cst_26 = arith.constant dense<0.000000e+00> : vector<8x128xf32>
      %35 = tpu.matmul %28, %26, %cst_26 {dimension_numbers = #tpu.dot_dimension_numbers<[1], [0], [0], [1], [0, 0, 1, 1], [], []>} : vector<8x128xf32>, vector<128x128xf32>, vector<8x128xf32> -> vector<8x128xf32>
      %36 = arith.addf %32, %35 : vector<8x128xf32>
      %37 = math.tanh %36 : vector<8x128xf32>
      %38 = arith.addi %27, %c0_i32_22 : i32
      %39 = vector.broadcast %38 : i32 to vector<8x1xi32>
      %40 = arith.cmpi sgt, %25, %39 : vector<8x1xi32>
      %41 = arith.mulf %37, %34 : vector<8x128xf32>
      %42 = vector.shape_cast %40 : vector<8x1xi1> to vector<8x1xi1>
      %43 = vector.broadcast %42 : vector<8x1xi1> to vector<8x128xi1>
      %44 = arith.select %43, %41, %28 : vector<8x128xi1>, vector<8x128xf32>
      %c1_i32 = arith.constant 1 : i32
      %c8_i32_27 = arith.constant 8 : i32
      %45 = arith.muli %c1_i32, %c8_i32_27 : i32
      %46 = tpu.assume_multiple %45, 8 : i32
      %47 = arith.index_cast %46 : i32 to index
      %c0_28 = arith.constant 0 : index
      %48 = vector.load %arg11[%47, %c0_28] : memref<64x256xf32, #tpu.memory_space<vmem>>, vector<8x128xf32>
      %49 = arith.index_cast %46 : i32 to index
      %c128_29 = arith.constant 128 : index
      %50 = vector.load %arg11[%49, %c128_29] : memref<64x256xf32, #tpu.memory_space<vmem>>, vector<8x128xf32>
      %cst_30 = arith.constant dense<0.000000e+00> : vector<8x128xf32>
      %51 = tpu.matmul %44, %26, %cst_30 {dimension_numbers = #tpu.dot_dimension_numbers<[1], [0], [0], [1], [0, 0, 1, 1], [], []>} : vector<8x128xf32>, vector<128x128xf32>, vector<8x128xf32> -> vector<8x128xf32>
      %52 = arith.addf %48, %51 : vector<8x128xf32>
      %53 = math.tanh %52 : vector<8x128xf32>
      %54 = arith.addi %27, %c1_i32 : i32
      %55 = vector.broadcast %54 : i32 to vector<8x1xi32>
      %56 = arith.cmpi sgt, %25, %55 : vector<8x1xi32>
      %57 = arith.mulf %53, %50 : vector<8x128xf32>
      %58 = vector.shape_cast %56 : vector<8x1xi1> to vector<8x1xi1>
      %59 = vector.broadcast %58 : vector<8x1xi1> to vector<8x128xi1>
      %60 = arith.select %59, %57, %44 : vector<8x128xi1>, vector<8x128xf32>
      %c2_i32_31 = arith.constant 2 : i32
      %c8_i32_32 = arith.constant 8 : i32
      %61 = arith.muli %c2_i32_31, %c8_i32_32 : i32
      %62 = tpu.assume_multiple %61, 8 : i32
      %63 = arith.index_cast %62 : i32 to index
      %c0_33 = arith.constant 0 : index
      %64 = vector.load %arg11[%63, %c0_33] : memref<64x256xf32, #tpu.memory_space<vmem>>, vector<8x128xf32>
      %65 = arith.index_cast %62 : i32 to index
      %c128_34 = arith.constant 128 : index
      %66 = vector.load %arg11[%65, %c128_34] : memref<64x256xf32, #tpu.memory_space<vmem>>, vector<8x128xf32>
      %cst_35 = arith.constant dense<0.000000e+00> : vector<8x128xf32>
      %67 = tpu.matmul %60, %26, %cst_35 {dimension_numbers = #tpu.dot_dimension_numbers<[1], [0], [0], [1], [0, 0, 1, 1], [], []>} : vector<8x128xf32>, vector<128x128xf32>, vector<8x128xf32> -> vector<8x128xf32>
      %68 = arith.addf %64, %67 : vector<8x128xf32>
      %69 = math.tanh %68 : vector<8x128xf32>
      %70 = arith.addi %27, %c2_i32_31 : i32
      %71 = vector.broadcast %70 : i32 to vector<8x1xi32>
      %72 = arith.cmpi sgt, %25, %71 : vector<8x1xi32>
      %73 = arith.mulf %69, %66 : vector<8x128xf32>
      %74 = vector.shape_cast %72 : vector<8x1xi1> to vector<8x1xi1>
      %75 = vector.broadcast %74 : vector<8x1xi1> to vector<8x128xi1>
      %76 = arith.select %75, %73, %60 : vector<8x128xi1>, vector<8x128xf32>
      %c3_i32 = arith.constant 3 : i32
      %c8_i32_36 = arith.constant 8 : i32
      %77 = arith.muli %c3_i32, %c8_i32_36 : i32
      %78 = tpu.assume_multiple %77, 8 : i32
      %79 = arith.index_cast %78 : i32 to index
      %c0_37 = arith.constant 0 : index
      %80 = vector.load %arg11[%79, %c0_37] : memref<64x256xf32, #tpu.memory_space<vmem>>, vector<8x128xf32>
      %81 = arith.index_cast %78 : i32 to index
      %c128_38 = arith.constant 128 : index
      %82 = vector.load %arg11[%81, %c128_38] : memref<64x256xf32, #tpu.memory_space<vmem>>, vector<8x128xf32>
      %cst_39 = arith.constant dense<0.000000e+00> : vector<8x128xf32>
      %83 = tpu.matmul %76, %26, %cst_39 {dimension_numbers = #tpu.dot_dimension_numbers<[1], [0], [0], [1], [0, 0, 1, 1], [], []>} : vector<8x128xf32>, vector<128x128xf32>, vector<8x128xf32> -> vector<8x128xf32>
      %84 = arith.addf %80, %83 : vector<8x128xf32>
      %85 = math.tanh %84 : vector<8x128xf32>
      %86 = arith.addi %27, %c3_i32 : i32
      %87 = vector.broadcast %86 : i32 to vector<8x1xi32>
      %88 = arith.cmpi sgt, %25, %87 : vector<8x1xi32>
      %89 = arith.mulf %85, %82 : vector<8x128xf32>
      %90 = vector.shape_cast %88 : vector<8x1xi1> to vector<8x1xi1>
      %91 = vector.broadcast %90 : vector<8x1xi1> to vector<8x128xi1>
      %92 = arith.select %91, %89, %76 : vector<8x128xi1>, vector<8x128xf32>
      %c4_i32 = arith.constant 4 : i32
      %c8_i32_40 = arith.constant 8 : i32
      %93 = arith.muli %c4_i32, %c8_i32_40 : i32
      %94 = tpu.assume_multiple %93, 8 : i32
      %95 = arith.index_cast %94 : i32 to index
      %c0_41 = arith.constant 0 : index
      %96 = vector.load %arg11[%95, %c0_41] : memref<64x256xf32, #tpu.memory_space<vmem>>, vector<8x128xf32>
      %97 = arith.index_cast %94 : i32 to index
      %c128_42 = arith.constant 128 : index
      %98 = vector.load %arg11[%97, %c128_42] : memref<64x256xf32, #tpu.memory_space<vmem>>, vector<8x128xf32>
      %cst_43 = arith.constant dense<0.000000e+00> : vector<8x128xf32>
      %99 = tpu.matmul %92, %26, %cst_43 {dimension_numbers = #tpu.dot_dimension_numbers<[1], [0], [0], [1], [0, 0, 1, 1], [], []>} : vector<8x128xf32>, vector<128x128xf32>, vector<8x128xf32> -> vector<8x128xf32>
      %100 = arith.addf %96, %99 : vector<8x128xf32>
      %101 = math.tanh %100 : vector<8x128xf32>
      %102 = arith.addi %27, %c4_i32 : i32
      %103 = vector.broadcast %102 : i32 to vector<8x1xi32>
      %104 = arith.cmpi sgt, %25, %103 : vector<8x1xi32>
      %105 = arith.mulf %101, %98 : vector<8x128xf32>
      %106 = vector.shape_cast %104 : vector<8x1xi1> to vector<8x1xi1>
      %107 = vector.broadcast %106 : vector<8x1xi1> to vector<8x128xi1>
      %108 = arith.select %107, %105, %92 : vector<8x128xi1>, vector<8x128xf32>
      %c5_i32 = arith.constant 5 : i32
      %c8_i32_44 = arith.constant 8 : i32
      %109 = arith.muli %c5_i32, %c8_i32_44 : i32
      %110 = tpu.assume_multiple %109, 8 : i32
      %111 = arith.index_cast %110 : i32 to index
      %c0_45 = arith.constant 0 : index
      %112 = vector.load %arg11[%111, %c0_45] : memref<64x256xf32, #tpu.memory_space<vmem>>, vector<8x128xf32>
      %113 = arith.index_cast %110 : i32 to index
      %c128_46 = arith.constant 128 : index
      %114 = vector.load %arg11[%113, %c128_46] : memref<64x256xf32, #tpu.memory_space<vmem>>, vector<8x128xf32>
      %cst_47 = arith.constant dense<0.000000e+00> : vector<8x128xf32>
      %115 = tpu.matmul %108, %26, %cst_47 {dimension_numbers = #tpu.dot_dimension_numbers<[1], [0], [0], [1], [0, 0, 1, 1], [], []>} : vector<8x128xf32>, vector<128x128xf32>, vector<8x128xf32> -> vector<8x128xf32>
      %116 = arith.addf %112, %115 : vector<8x128xf32>
      %117 = math.tanh %116 : vector<8x128xf32>
      %118 = arith.addi %27, %c5_i32 : i32
      %119 = vector.broadcast %118 : i32 to vector<8x1xi32>
      %120 = arith.cmpi sgt, %25, %119 : vector<8x1xi32>
      %121 = arith.mulf %117, %114 : vector<8x128xf32>
      %122 = vector.shape_cast %120 : vector<8x1xi1> to vector<8x1xi1>
      %123 = vector.broadcast %122 : vector<8x1xi1> to vector<8x128xi1>
      %124 = arith.select %123, %121, %108 : vector<8x128xi1>, vector<8x128xf32>
      %c6_i32 = arith.constant 6 : i32
      %c8_i32_48 = arith.constant 8 : i32
      %125 = arith.muli %c6_i32, %c8_i32_48 : i32
      %126 = tpu.assume_multiple %125, 8 : i32
      %127 = arith.index_cast %126 : i32 to index
      %c0_49 = arith.constant 0 : index
      %128 = vector.load %arg11[%127, %c0_49] : memref<64x256xf32, #tpu.memory_space<vmem>>, vector<8x128xf32>
      %129 = arith.index_cast %126 : i32 to index
      %c128_50 = arith.constant 128 : index
      %130 = vector.load %arg11[%129, %c128_50] : memref<64x256xf32, #tpu.memory_space<vmem>>, vector<8x128xf32>
      %cst_51 = arith.constant dense<0.000000e+00> : vector<8x128xf32>
      %131 = tpu.matmul %124, %26, %cst_51 {dimension_numbers = #tpu.dot_dimension_numbers<[1], [0], [0], [1], [0, 0, 1, 1], [], []>} : vector<8x128xf32>, vector<128x128xf32>, vector<8x128xf32> -> vector<8x128xf32>
      %132 = arith.addf %128, %131 : vector<8x128xf32>
      %133 = math.tanh %132 : vector<8x128xf32>
      %134 = arith.addi %27, %c6_i32 : i32
      %135 = vector.broadcast %134 : i32 to vector<8x1xi32>
      %136 = arith.cmpi sgt, %25, %135 : vector<8x1xi32>
      %137 = arith.mulf %133, %130 : vector<8x128xf32>
      %138 = vector.shape_cast %136 : vector<8x1xi1> to vector<8x1xi1>
      %139 = vector.broadcast %138 : vector<8x1xi1> to vector<8x128xi1>
      %140 = arith.select %139, %137, %124 : vector<8x128xi1>, vector<8x128xf32>
      %c7_i32 = arith.constant 7 : i32
      %c8_i32_52 = arith.constant 8 : i32
      %141 = arith.muli %c7_i32, %c8_i32_52 : i32
      %142 = tpu.assume_multiple %141, 8 : i32
      %143 = arith.index_cast %142 : i32 to index
      %c0_53 = arith.constant 0 : index
      %144 = vector.load %arg11[%143, %c0_53] : memref<64x256xf32, #tpu.memory_space<vmem>>, vector<8x128xf32>
      %145 = arith.index_cast %142 : i32 to index
      %c128_54 = arith.constant 128 : index
      %146 = vector.load %arg11[%145, %c128_54] : memref<64x256xf32, #tpu.memory_space<vmem>>, vector<8x128xf32>
      %cst_55 = arith.constant dense<0.000000e+00> : vector<8x128xf32>
      %147 = tpu.matmul %140, %26, %cst_55 {dimension_numbers = #tpu.dot_dimension_numbers<[1], [0], [0], [1], [0, 0, 1, 1], [], []>} : vector<8x128xf32>, vector<128x128xf32>, vector<8x128xf32> -> vector<8x128xf32>
      %148 = arith.addf %144, %147 : vector<8x128xf32>
      %149 = math.tanh %148 : vector<8x128xf32>
      %150 = arith.addi %27, %c7_i32 : i32
      %151 = vector.broadcast %150 : i32 to vector<8x1xi32>
      %152 = arith.cmpi sgt, %25, %151 : vector<8x1xi32>
      %153 = arith.mulf %149, %146 : vector<8x128xf32>
      %154 = vector.shape_cast %152 : vector<8x1xi1> to vector<8x1xi1>
      %155 = vector.broadcast %154 : vector<8x1xi1> to vector<8x128xi1>
      %156 = arith.select %155, %153, %140 : vector<8x128xi1>, vector<8x128xf32>
      %c8_i32_56 = arith.constant 8 : i32
      %c0_57 = arith.constant 0 : index
      %c0_58 = arith.constant 0 : index
      %157 = vector.load %arg12[%c0_57, %c0_58] : memref<8x128xf32, #tpu.memory_space<vmem>>, vector<8x128xf32>
      tpu.vector_store %arg12[%c0_57, %c0_58], %156 {strides = array<i32>} : memref<8x128xf32, #tpu.memory_space<vmem>>, vector<8x128xf32>,
    } else {
    }
    %c2_i32 = arith.constant 2 : i32
    %7 = arith.cmpi eq, %arg1, %c2_i32 : i32
    %8 = arith.extui %7 : i1 to i32
    %c0_i32_2 = arith.constant 0 : i32
    %9 = arith.cmpi ne, %8, %c0_i32_2 : i32
    scf.if %9 {
      %c0_3 = arith.constant 0 : index
      %c0_4 = arith.constant 0 : index
      %10 = vector.load %arg12[%c0_3, %c0_4] : memref<8x128xf32, #tpu.memory_space<vmem>>, vector<8x128xf32>
      %c0_5 = arith.constant 0 : index
      %c0_6 = arith.constant 0 : index
      %11 = vector.load %arg8[%c0_5, %c0_6] : memref<128x128xf32, #tpu.memory_space<vmem>>, vector<128x128xf32>
      %cst = arith.constant dense<0.000000e+00> : vector<8x128xf32>
      %12 = tpu.matmul %10, %11, %cst {dimension_numbers = #tpu.dot_dimension_numbers<[1], [0], [0], [1], [0, 0, 1, 1], [], []>} : vector<8x128xf32>, vector<128x128xf32>, vector<8x128xf32> -> vector<8x128xf32>
      %c0_7 = arith.constant 0 : index
      %c0_8 = arith.constant 0 : index
      %13 = vector.load %arg9[%c0_7, %c0_8] : memref<1x128xf32, #tpu.memory_space<vmem>>, vector<1x128xf32>
      %14 = vector.broadcast %13 : vector<1x128xf32> to vector<8x128xf32>
      %15 = arith.addf %12, %14 : vector<8x128xf32>
      %c0_9 = arith.constant 0 : index
      %c0_10 = arith.constant 0 : index
      %16 = vector.load %arg10[%c0_9, %c0_10] : memref<8x128xf32, #tpu.memory_space<vmem>>, vector<8x128xf32>
      tpu.vector_store %arg10[%c0_9, %c0_10], %15 {strides = array<i32>} : memref<8x128xf32, #tpu.memory_space<vmem>>, vector<8x128xf32>,
    } else {
    }
    return
  }
  func.func @transform_0(%arg0: i32, %arg1: i32, %arg2: memref<1xi32, #tpu.memory_space<smem>>) -> (i32, i32, i32) {
    %c0 = arith.constant 0 : index
    %0 = memref.load %arg2[%c0] : memref<1xi32, #tpu.memory_space<smem>>
    %c1_i32 = arith.constant 1 : i32
    %1 = arith.subi %0, %c1_i32 : i32
    %2 = arith.minsi %arg1, %1 : i32
    %c0_i32 = arith.constant 0 : i32
    %c0_i32_0 = arith.constant 0 : i32
    return %2, %arg0, %c0_i32 : i32, i32, i32
  }
  func.func @transform_1(%arg0: i32, %arg1: i32, %arg2: memref<1xi32, #tpu.memory_space<smem>>) -> (i32, i32) {
    %c0_i32 = arith.constant 0 : i32
    %c0_i32_0 = arith.constant 0 : i32
    return %arg0, %c0_i32 : i32, i32
  }
  func.func @transform_2(%arg0: i32, %arg1: i32, %arg2: memref<1xi32, #tpu.memory_space<smem>>) -> (i32, i32) {
    %c0_i32 = arith.constant 0 : i32
    %c0_i32_0 = arith.constant 0 : i32
    %c0_i32_1 = arith.constant 0 : i32
    return %c0_i32, %c0_i32_0 : i32, i32
  }
  func.func @transform_3(%arg0: i32, %arg1: i32, %arg2: memref<1xi32, #tpu.memory_space<smem>>) -> (i32, i32) {
    %c0_i32 = arith.constant 0 : i32
    %c0_i32_0 = arith.constant 0 : i32
    %c0_i32_1 = arith.constant 0 : i32
    return %c0_i32, %c0_i32_0 : i32, i32
  }
  func.func @transform_4(%arg0: i32, %arg1: i32, %arg2: memref<1xi32, #tpu.memory_space<smem>>) -> (i32, i32) {
    %c0_i32 = arith.constant 0 : i32
    %c0_i32_0 = arith.constant 0 : i32
    %c0_i32_1 = arith.constant 0 : i32
    return %c0_i32, %c0_i32_0 : i32, i32
  }
  func.func @transform_5(%arg0: i32, %arg1: i32, %arg2: memref<1xi32, #tpu.memory_space<smem>>) -> (i32, i32) {
    %c0_i32 = arith.constant 0 : i32
    %c0_i32_0 = arith.constant 0 : i32
    %c0_i32_1 = arith.constant 0 : i32
    return %c0_i32, %c0_i32_0 : i32, i32
  }
  func.func @transform_6(%arg0: i32, %arg1: i32, %arg2: memref<1xi32, #tpu.memory_space<smem>>) -> (i32, i32) {
    %c0_i32 = arith.constant 0 : i32
    %c0_i32_0 = arith.constant 0 : i32
    %c0_i32_1 = arith.constant 0 : i32
    return %c0_i32, %c0_i32_0 : i32, i32
  }
  func.func @transform_7(%arg0: i32, %arg1: i32, %arg2: memref<1xi32, #tpu.memory_space<smem>>) -> (i32, i32) {
    %c0_i32 = arith.constant 0 : i32
    %c0_i32_0 = arith.constant 0 : i32
    return %arg0, %c0_i32 : i32, i32
  }
}

</mosaic_0001>

<bundles_post_ra>
// kernel: flow_control_rnn_forward.1
= control target key start
LH: loop header
LB: loop body
LE: loop exit
PB: predicated region body
PF: predicated region fallthrough
CT: control target
= control target key end

     0   :  { %s1809_s0 = inlined_call_operand.<no memory space> [shape: s32[1], index: 0, kind: input, shape index: {}]   ;;  %s1810_s1 = inlined_call_operand.vmem [shape: f32[24,8,128], index: 1, kind: input, shape index: {}]   ;;  %s1811_s2 = inlined_call_operand.vmem [shape: s32[8,1], index: 2, kind: input, shape index: {}]   ;;  %s1812_s3 = inlined_call_operand.vmem [shape: f32[128,256], index: 3, kind: input, shape index: {}]   ;;  %s1813_s4 = inlined_call_operand.vmem [shape: f32[1,256], index: 4, kind: input, shape index: {}]   ;;  %s1814_s5 = inlined_call_operand.vmem [shape: f32[128,128], index: 5, kind: input, shape index: {}]   ;;  %s1815_s6 = inlined_call_operand.vmem [shape: f32[128,128], index: 6, kind: input, shape index: {}]   ;;  %s1816_s7 = inlined_call_operand.vmem [shape: f32[1,128], index: 7, kind: input, shape index: {}]   ;;  %s1817_s8 = inlined_call_operand.hbm [shape: f32[8,128], index: 8, kind: output, shape index: {}]  }
   0x1   :  { %13 = sst [smem:[#allocation5]] %s1809_s0 }
   0x2   :  { %14 = vsyncpa [#allocation7], 0  ;;  %s1329_s29 = smov 0   ;;  %s1331_s30 = smov 0  }
   0x3   :  { %s1333_s9 = smov 0  }
   0x4 LB: > { %s1111_s0 = sadd.s32 4294967295, %s1276_s9   ;;  %s29_s10 = sadd.s32 1, %s1272_s30  ;;  %s1276_s9 = sphi %s1333_s9, %s20_s9   ;;  %s1272_s30 = sphi %s1331_s30, %s1819_s30   ;;  %s1268_s29 = sphi %s1329_s29, %s1818_s29  }
   0x5   : > { %p30_p0 = scmp.ge.s32.totalorder %s29_s10, 3  ;;  %p1117_p1 = scmp.ge.s32.totalorder %s1276_s9, 1 }
   0x6   : > { %p283_p2 = scmp.lt.s32.totalorder %s1276_s9, 4 }
   0x7   : > { %s1821_s10 = smov (%p30_p0, %s29_s10), 0 }
   0x8   : > { %p284_p3 = pnand %p1117_p1, %p283_p2 }
   0x9   : > { %s321_s11 = sld [smem:[#allocation5]] (!%p284_p3)  ;;  %p1121_p6 = scmp.ne.s32.totalorder (!%p284_p3), %s1268_s29, 0 }
   0xa   : > { %287 = sbr.rel (%p284_p3) target bundleno = 1403 (0x57b), region = 48 }
   0xf   : > { %s1118_s12 = sadd.s32 4294967295, %s321_s11 }
  0x10   : > { %p323_p4 = scmp.lt.s32.totalorder %s1268_s29, %s1118_s12 }
  0x12   : > { %s324_s13 = scalar_select %p323_p4, %s1268_s29, %s1118_s12 }
  0x14   : > { %s1119_s14 = sshll.u32 %s324_s13, 3 }
  0x15   : > { %p326_p5 = scmp.lt.s32.totalorder %s1119_s14, 23  ;;  %345 = sbr.rel (%p1121_p6) target bundleno = 28 (0x1c), region = 52 }
  0x17   : > { %s1823_s14 = smov (!%p326_p5, %s1119_s14), 23 }
  0x18   : > { %s1120_s15 = sshll.u32 %s1823_s14, 3 }
  0x19   : > { %s1355_s18 = scalar_lea.vmem %s1810_s1, %s1120_s15 }
  0x1a   : > { %v1278_v0 = vmov 0.0  }
  0x1b   : > { %346 = vst [vmem:[#allocation3] sm:$0xff] %v1278_v0 }
  0x1c PF: > { %s347_s19 = sld [smem:[#allocation5]] }
  0x22   : > { %p1122_p7 = scmp.ge.s32.totalorder %s1268_s29, %s347_s19 }
  0x23   : > { %s1435_s22 = sshll.u32 (!%p1122_p7), %s1268_s29, 3 }
  0x24   : > { %351 = sbr.rel (%p1122_p7) target bundleno = 1229 (0x4cd), region = 56  ;;  %s746_s25 = sadd.s32 (!%p1122_p7), 1, %s1435_s22 }
  0x25   : > { %s931_s16 = sadd.s32 (!%p1122_p7), 6, %s1435_s22  ;;  %s820_s26 = sadd.s32 (!%p1122_p7), 3, %s1435_s22 }
  0x26   : > { %s968_s27 = sadd.s32 (!%p1122_p7), 7, %s1435_s22  ;;  %s857_s28 = sadd.s32 (!%p1122_p7), 4, %s1435_s22 }
  0x27   : > { %s894_s11 = sadd.s32 (!%p1122_p7), 5, %s1435_s22 }
  0x29   : > { %v391_v1 = vld [vmem:[%s1812_s3 + $0xf8] sm:$0xff]  ;;  %v389_v2 = vld [vmem:[%s1812_s3 + $0xe8] sm:$0xff]  ;;  %v1377_v5 = vld [vmem:[%s1814_s5 + $0x70] sm:$0xff]  ;;  %v1279_v12 = vmov 0   ;;  %v710_v25 = vstv %s1435_s22 }
  0x2a   : > { %439 = vmatpush.msra.mxu1 %v391_v1  ;;  %v387_v3 = vld [vmem:[%s1812_s3 + $0xd8] sm:$0xff]  ;;  %v385_v6 = vld [vmem:[%s1812_s3 + $0xc8] sm:$0xff]  ;;  %v390_v7 = vld [vmem:[%s1812_s3 + $0xf0] sm:$0xff]  ;;  %1170 = vset.pattern.permute.xlu0 %v1279_v12  ;;  %v747_v35 = vstv %s746_s25  ;;  %s783_s25 = sadd.s32 2, %s1435_s22 }
  0x2b   : > { %v1371_v4 = vld [vmem:[%s1814_s5 + $0x78] sm:$0xff]  ;;  %v1388_v8 = vld [vmem:[%s1814_s5 + $0x68] sm:$0xff]  ;;  %v388_v9 = vld [vmem:[%s1812_s3 + $0xe0] sm:$0xff]  ;;  %398 = vmatpush.msra.mxu0 %v390_v7  ;;  %v932_v49 = vstv %s931_s16  ;;  %1171 = vset.pattern.permute.xlu1 %v1279_v12 }
  0x2c   : > { %440 = vmatpush.msra.mxu1 %v389_v2  ;;  %688 = vmatpush.msra.mxu2 %v1371_v4  ;;  %v383_v10 = vld [vmem:[%s1812_s3 + $0xb8] sm:$0xff]  ;;  %v1401_v11 = vld [vmem:[%s1814_s5 + $0x60] sm:$0xff]  ;;  %v386_v13 = vld [vmem:[%s1812_s3 + $0xd0] sm:$0xff] }
  0x2d   : > { %724 = vmatpush.msra.mxu3 %v1371_v4  ;;  %v381_v14 = vld [vmem:[%s1812_s3 + $0xa8] sm:$0xff]  ;;  %399 = vmatpush.msra.mxu0 %v388_v9  ;;  %v1414_v15 = vld [vmem:[%s1814_s5 + $0x58] sm:$0xff]  ;;  %v384_v16 = vld [vmem:[%s1812_s3 + $0xc0] sm:$0xff] }
  0x2e   : > { %441 = vmatpush.msra.mxu1 %v387_v3  ;;  %689 = vmatpush.msra.mxu2 %v1377_v5  ;;  %v379_v17 = vld [vmem:[%s1812_s3 + $0x98] sm:$0xff]  ;;  %v1427_v18 = vld [vmem:[%s1814_s5 + $0x50] sm:$0xff]  ;;  %v377_v20 = vld [vmem:[%s1812_s3 + $0x88] sm:$0xff] }
  0x2f   : > { %725 = vmatpush.msra.mxu3 %v1377_v5  ;;  %400 = vmatpush.msra.mxu0 %v386_v13  ;;  %v382_v19 = vld [vmem:[%s1812_s3 + $0xb0] sm:$0xff]  ;;  %v1443_v21 = vld [vmem:[%s1814_s5 + $0x48] sm:$0xff]  ;;  %v380_v22 = vld [vmem:[%s1812_s3 + $0xa0] sm:$0xff] }
  0x30   : > { %442 = vmatpush.msra.mxu1 %v385_v6  ;;  %690 = vmatpush.msra.mxu2 %v1388_v8  ;;  %v375_v23 = vld [vmem:[%s1812_s3 + $0x78] sm:$0xff]  ;;  %v1456_v24 = vld [vmem:[%s1814_s5 + $0x40] sm:$0xff]  ;;  %v378_v26 = vld [vmem:[%s1812_s3 + $0x90] sm:$0xff] }
  0x31   : > { %726 = vmatpush.msra.mxu3 %v1388_v8  ;;  %401 = vmatpush.msra.mxu0 %v384_v16  ;;  %v373_v27 = vld [vmem:[%s1812_s3 + $0x68] sm:$0xff]  ;;  %v1470_v28 = vld [vmem:[%s1814_s5 + $0x38] sm:$0xff]  ;;  %v1475_v29 = vld [vmem:[%s1811_s2] sm:$0xff] }
  0x32   : > { %443 = vmatpush.msra.mxu1 %v383_v10  ;;  %691 = vmatpush.msra.mxu2 %v1401_v11  ;;  %v376_v30 = vld [vmem:[%s1812_s3 + $0x80] sm:$0xff]  ;;  %vm711_vm0 = vcmp.gt.s32.totalorder %v1475_v29, %v710_v25  ;;  %v371_v31 = vld [vmem:[%s1812_s3 + $0x58] sm:$0xff]  ;;  %v1490_v32 = vld [vmem:[%s1814_s5 + $0x30] sm:$0xff]  ;;  %vm748_vm1 = vcmp.gt.s32.totalorder %v1475_v29, %v747_v35  ;;  %vm933_vm2 = vcmp.gt.s32.totalorder %v1475_v29, %v932_v49 }
  0x33   : > { %727 = vmatpush.msra.mxu3 %v1401_v11  ;;  %402 = vmatpush.msra.mxu0 %v382_v19  ;;  %v713_v33 = vsel %vm711_vm0, 1, %v1279_v12  ;;  %v374_v34 = vld [vmem:[%s1812_s3 + $0x70] sm:$0xff]  ;;  %v369_v36 = vld [vmem:[%s1812_s3 + $0x48] sm:$0xff]  ;;  %v372_v38 = vld [vmem:[%s1812_s3 + $0x60] sm:$0xff]  ;;  %v750_v45 = vsel %vm748_vm1, 1, %v1279_v12  ;;  %v935_v58 = vsel %vm933_vm2, 1, %v1279_v12 }
  0x34   : > { %444 = vmatpush.msra.mxu1 %v381_v14  ;;  %692 = vmatpush.msra.mxu2 %v1414_v15  ;;  %v1504_v37 = vld [vmem:[%s1814_s5 + $0x28] sm:$0xff]  ;;  %v367_v39 = vld [vmem:[%s1812_s3 + $0x38] sm:$0xff]  ;;  %v1516_v40 = vld [vmem:[%s1814_s5 + $0x20] sm:$0xff] }
  0x35   : > { %728 = vmatpush.msra.mxu3 %v1414_v15  ;;  %403 = vmatpush.msra.mxu0 %v380_v22  ;;  %v370_v41 = vld [vmem:[%s1812_s3 + $0x50] sm:$0xff]  ;;  %v365_v42 = vld [vmem:[%s1812_s3 + $0x28] sm:$0xff]  ;;  %v1530_v43 = vld [vmem:[%s1814_s5 + $0x18] sm:$0xff] }
  0x36   : > { %445 = vmatpush.msra.mxu1 %v379_v17  ;;  %693 = vmatpush.msra.mxu2 %v1427_v18  ;;  %v368_v44 = vld [vmem:[%s1812_s3 + $0x40] sm:$0xff]  ;;  %v363_v46 = vld [vmem:[%s1812_s3 + $0x18] sm:$0xff]  ;;  %v1545_v47 = vld [vmem:[%s1814_s5 + $0x10] sm:$0xff] }
  0x37   : > { %729 = vmatpush.msra.mxu3 %v1427_v18  ;;  %404 = vmatpush.msra.mxu0 %v378_v26  ;;  %v366_v48 = vld [vmem:[%s1812_s3 + $0x30] sm:$0xff]  ;;  %v361_v50 = vld [vmem:[%s1812_s3 + $0x8] sm:$0xff]  ;;  %v352_v52 = vld [vmem:[%s1355_s18] sm:$0xff] }
  0x38   : > { %446 = vmatpush.msra.mxu1 %v377_v20  ;;  %694 = vmatpush.msra.mxu2 %v1443_v21  ;;  %v1558_v51 = vld [vmem:[%s1814_s5 + $0x8] sm:$0xff]  ;;  %v364_v53 = vld [vmem:[%s1812_s3 + $0x20] sm:$0xff]  ;;  %v362_v56 = vld [vmem:[%s1812_s3 + $0x10] sm:$0xff] }
  0x39   : > { %730 = vmatpush.msra.mxu3 %v1443_v21  ;;  %405 = vmatpush.msra.mxu0 %v376_v30  ;;  %v1568_v54 = vld [vmem:[%s1814_s5] sm:$0xff]  ;;  %v353_v59 = vld [vmem:[%s1355_s18 + $0x8] sm:$0xff] }
  0x3a   : > { %447 = vmatpush.msra.mxu1 %v375_v23  ;;  %695 = vmatpush.msra.mxu2 %v1456_v24  ;;  %v1573_v55 = vld [vmem:[#allocation3] sm:$0xff] }
  0x3b   : > { %715 = vperm.xlu0 %1170, %v713_v33   ;;  %406 = vmatpush.msra.mxu0 %v374_v34  ;;  %v360_v57 = vld [vmem:[%s1812_s3] sm:$0xff] }
  0x3c   : > { %448 = vmatpush.msra.mxu1 %v373_v27  ;;  %696 = vmatpush.msra.mxu2 %v1470_v28  ;;  %v392_v60 = vld [vmem:[%s1813_s4] sm:$0x3] }
  0x3d   : > { %731 = vmatpush.msra.mxu3 %v1456_v24  ;;  %407 = vmatpush.msra.mxu0 %v372_v38  ;;  %v1675_v61 = vperm.slane %v392_v60, 1  ;;  %v1678_v1 = vperm.slane %v392_v60, 0 }
  0x3e   : > { %449 = vmatpush.msra.mxu1 %v371_v31  ;;  %697 = vmatpush.msra.mxu2 %v1490_v32 }
  0x3f   : > { %732 = vmatpush.msra.mxu3 %v1470_v28  ;;  %408 = vmatpush.msra.mxu0 %v370_v41 }
  0x40   : > { %450 = vmatpush.msra.mxu1 %v369_v36  ;;  %698 = vmatpush.msra.mxu2 %v1504_v37  ;;  %v969_v36 = vstv %s968_s27 }
  0x41   : > { %733 = vmatpush.msra.mxu3 %v1490_v32  ;;  %409 = vmatpush.msra.mxu0 %v368_v44  ;;  %vm970_vm10 = vcmp.gt.s32.totalorder %v1475_v29, %v969_v36 }
  0x42   : > { %451 = vmatpush.msra.mxu1 %v367_v39  ;;  %699 = vmatpush.msra.mxu2 %v1516_v40 }
  0x43   : > { %752 = vperm.xlu0 %1170, %v750_v45   ;;  %410 = vmatpush.msra.mxu0 %v366_v48 }
  0x44   : > { %452 = vmatpush.msra.mxu1 %v365_v42  ;;  %700 = vmatpush.msra.mxu2 %v1530_v43 }
  0x45   : > { %734 = vmatpush.msra.mxu3 %v1504_v37  ;;  %411 = vmatpush.msra.mxu0 %v364_v53 }
  0x46   : > { %453 = vmatpush.msra.mxu1 %v363_v46  ;;  %701 = vmatpush.msra.mxu2 %v1545_v47 }
  0x47   : > { %735 = vmatpush.msra.mxu3 %v1516_v40  ;;  %412 = vmatpush.msra.mxu0 %v362_v56 }
  0x48   : > { %454 = vmatpush.msra.mxu1 %v361_v50  ;;  %702 = vmatpush.msra.mxu2 %v1558_v51 }
  0x49   : > { %455 = vmatmul.f32.vlgmr.msra.gmra.mxu1 %v352_v52  ;;  %736 = vmatpush.msra.mxu3 %v1530_v43 }
  0x4a   : > { %703 = vmatpush.msra.mxu2 %v1568_v54  ;;  %413 = vmatpush.msra.mxu0 %v360_v57 }
  0x4b   : > { %704 = vmatmul.f32.vlgmr.msra.gmra.mxu2 %v1573_v55  ;;  %937 = vperm.xlu0 %1170, %v935_v58  }
  0x4c   : > { %761 = vmatpush.msrb.mxu2 %v1371_v4  ;;  %414 = vmatmul.f32.vlgmr.msra.gmra.mxu0 %v352_v52 }
  0x4d   : > { %737 = vmatpush.msra.mxu3 %v1545_v47  ;;  %835 = vmatpush.msrb.mxu0 %v1371_v4 }
  0x4e   : > { %762 = vmatpush.msrb.mxu2 %v1377_v5  ;;  %1172 = vset.pattern.permute.xlu2 %v1279_v12 }
  0x4f   : > { %738 = vmatpush.msra.mxu3 %v1558_v51  ;;  %836 = vmatpush.msrb.mxu0 %v1377_v5 }
  0x50   : > { %763 = vmatpush.msrb.mxu2 %v1388_v8  ;;  %872 = vmatpush.msrb.mxu1 %v1371_v4 }
  0x51   : > { %739 = vmatpush.msra.mxu3 %v1568_v54  ;;  %837 = vmatpush.msrb.mxu0 %v1388_v8 }
  0x52   : > { %764 = vmatpush.msrb.mxu2 %v1401_v11  ;;  %873 = vmatpush.msrb.mxu1 %v1377_v5 }
  0x53   : > { %798 = vmatpush.msrb.mxu3 %v1371_v4  ;;  %838 = vmatpush.msrb.mxu0 %v1401_v11 }
  0x54   : > { %765 = vmatpush.msrb.mxu2 %v1414_v15  ;;  %874 = vmatpush.msrb.mxu1 %v1388_v8 }
  0x55   : > { %799 = vmatpush.msrb.mxu3 %v1377_v5  ;;  %839 = vmatpush.msrb.mxu0 %v1414_v15 }
  0x56   : > { %766 = vmatpush.msrb.mxu2 %v1427_v18  ;;  %875 = vmatpush.msrb.mxu1 %v1401_v11 }
  0x57   : > { %800 = vmatpush.msrb.mxu3 %v1388_v8  ;;  %840 = vmatpush.msrb.mxu0 %v1427_v18 }
  0x58   : > { %767 = vmatpush.msrb.mxu2 %v1443_v21  ;;  %876 = vmatpush.msrb.mxu1 %v1414_v15 }
  0x59   : > { %801 = vmatpush.msrb.mxu3 %v1401_v11  ;;  %841 = vmatpush.msrb.mxu0 %v1443_v21 }
  0x5a   : > { %768 = vmatpush.msrb.mxu2 %v1456_v24  ;;  %877 = vmatpush.msrb.mxu1 %v1427_v18 }
  0x5b   : > { %802 = vmatpush.msrb.mxu3 %v1414_v15  ;;  %842 = vmatpush.msrb.mxu0 %v1456_v24 }
  0x5c   : > { %769 = vmatpush.msrb.mxu2 %v1470_v28  ;;  %878 = vmatpush.msrb.mxu1 %v1443_v21 }
  0x5d   : > { %803 = vmatpush.msrb.mxu3 %v1427_v18  ;;  %843 = vmatpush.msrb.mxu0 %v1470_v28 }
  0x5e   : > { %770 = vmatpush.msrb.mxu2 %v1490_v32  ;;  %879 = vmatpush.msrb.mxu1 %v1456_v24 }
  0x5f   : > { %804 = vmatpush.msrb.mxu3 %v1443_v21  ;;  %844 = vmatpush.msrb.mxu0 %v1490_v32 }
  0x60   : > { %771 = vmatpush.msrb.mxu2 %v1504_v37  ;;  %880 = vmatpush.msrb.mxu1 %v1470_v28 }
  0x61   : > { %805 = vmatpush.msrb.mxu3 %v1456_v24  ;;  %845 = vmatpush.msrb.mxu0 %v1504_v37 }
  0x62   : > { %772 = vmatpush.msrb.mxu2 %v1516_v40  ;;  %881 = vmatpush.msrb.mxu1 %v1490_v32 }
  0x63   : > { %806 = vmatpush.msrb.mxu3 %v1470_v28  ;;  %846 = vmatpush.msrb.mxu0 %v1516_v40 }
  0x64   : > { %773 = vmatpush.msrb.mxu2 %v1530_v43  ;;  %882 = vmatpush.msrb.mxu1 %v1504_v37 }
  0x65   : > { %807 = vmatpush.msrb.mxu3 %v1490_v32  ;;  %847 = vmatpush.msrb.mxu0 %v1530_v43 }
  0x66   : > { %774 = vmatpush.msrb.mxu2 %v1545_v47  ;;  %883 = vmatpush.msrb.mxu1 %v1516_v40 }
  0x67   : > { %808 = vmatpush.msrb.mxu3 %v1504_v37  ;;  %848 = vmatpush.msrb.mxu0 %v1545_v47 }
  0x68   : > { %775 = vmatpush.msrb.mxu2 %v1558_v51  ;;  %884 = vmatpush.msrb.mxu1 %v1530_v43 }
  0x69   : > { %809 = vmatpush.msrb.mxu3 %v1516_v40  ;;  %849 = vmatpush.msrb.mxu0 %v1558_v51 }
  0x6a   : > { %776 = vmatpush.msrb.mxu2 %v1568_v54  ;;  %885 = vmatpush.msrb.mxu1 %v1545_v47 }
  0x6b   : > { %810 = vmatpush.msrb.mxu3 %v1530_v43  ;;  %850 = vmatpush.msrb.mxu0 %v1568_v54 }
  0x6c   : > { %909 = vmatpush.msra.mxu2 %v1371_v4  ;;  %886 = vmatpush.msrb.mxu1 %v1558_v51 }
  0x6d   : > { %811 = vmatpush.msrb.mxu3 %v1545_v47  ;;  %458 = vmatmul.f32.gmra.mxu1 %v353_v59 }
  0x6e   : > { %910 = vmatpush.msra.mxu2 %v1377_v5  ;;  %887 = vmatpush.msrb.mxu1 %v1568_v54 }
  0x6f   : > { %812 = vmatpush.msrb.mxu3 %v1558_v51  ;;  %417 = vmatmul.f32.gmra.mxu0 %v353_v59 }
  0x70   : > { %911 = vmatpush.msra.mxu2 %v1388_v8 }
  0x71   : > { %813 = vmatpush.msrb.mxu3 %v1568_v54 }
  0x72   : > { %912 = vmatpush.msra.mxu2 %v1401_v11 }
  0x74   : > { %913 = vmatpush.msra.mxu2 %v1414_v15 }
  0x76   : > { %914 = vmatpush.msra.mxu2 %v1427_v18 }
  0x78   : > { %915 = vmatpush.msra.mxu2 %v1443_v21 }
  0x7a   : > { %916 = vmatpush.msra.mxu2 %v1456_v24 }
  0x7c   : > { %917 = vmatpush.msra.mxu2 %v1470_v28 }
  0x7e   : > { %918 = vmatpush.msra.mxu2 %v1490_v32 }
  0x80   : > { %919 = vmatpush.msra.mxu2 %v1504_v37 }
  0x82   : > { %920 = vmatpush.msra.mxu2 %v1516_v40 }
  0x84   : > { %921 = vmatpush.msra.mxu2 %v1530_v43 }
  0x86   : > { %922 = vmatpush.msra.mxu2 %v1545_v47 }
  0x88   : > { %923 = vmatpush.msra.mxu2 %v1558_v51 }
  0x8a   : > { %924 = vmatpush.msra.mxu2 %v1568_v54 }
  0xad   : > { %v716_v26 = vpop.permute.xlu0 %715 }
  0xae   : > { %vm717_vm7 = vcmp.eq.s32.totalorder %v716_v26, 1  ;;  %v357_v26 = vld [vmem:[%s1355_s18 + $0x28] sm:$0xff] }
  0xc6   : > { %v456_v62 = vpop.f32.mrf.mxu1 }
  0xc7   : > { %v457_v63 = vadd.f32 %v456_v62, %v1675_v61 }
  0xc9   : > { %v1123_v0 = vmul.f32 -1.442695, %v457_v63  ;;  %v415_v3 = vpop.f32.mrf.mxu0 }
  0xca   : > { %v416_v7 = vadd.f32 %v415_v3, %v1678_v1 }
  0xcb   : > { %1173 = vpow2.f32 %v1123_v0 }
  0xce   : > { %v705_v9 = vpop.f32.mrf.mxu2 }
  0xcf   : > { %v708_v10 = vadd.f32 %v705_v9, %v416_v7 }
  0xd1   : > { %v1174_v2 = vpop.eup %1173 }
  0xd2   : > { %v528_v6 = vadd.f32 1.0, %v1174_v2 }
  0xd4   : > { %1175 = vrcp.f32 %v528_v6  ;;  %v547_v17 = vand.u32 2147483648, %v528_v6  ;;  %v545_v20 = vand.u32 2147483647, %v528_v6  ;;  %vm541_vm4 = vweird.f32 %v528_v6 }
  0xd5   : > { %1177 = vtanh.f32 %v708_v10 }
  0xd6   : > { %v548_v25 = vor.u32 1.1754944e-38, %v547_v17  ;;  %vm546_vm6 = vcmp.eq.f32.partialorder %v545_v20, 8.507059e+37 }
  0xda   : > { %v1176_v13 = vpop.eup %1175 }
  0xdb   : > { %v537_v14 = vmul.f32 %v1176_v13, %v528_v6  ;;  %vm542_vm3 = vweird.f32 %v1176_v13  ;;  %v1178_v23 = vpop.eup %1177 }
  0xdc   : > { %vm543_vm5 = vmor %vm541_vm4, %vm542_vm3 }
  0xdd   : > { %v538_v16 = vsub.f32 1.0, %v537_v14 }
  0xdf   : > { %v539_v19 = vmul.f32 %v1176_v13, %v538_v16 }
  0xe1   : > { %v540_v22 = vadd.f32 %v1176_v13, %v539_v19 }
  0xe3   : > { %v544_v27 = vsel %vm543_vm5, %v1176_v13, %v540_v22 }
  0xe4   : > { %v549_v30 = vsel %vm546_vm6, %v548_v25, %v544_v27  ;;  %v356_v25 = vld [vmem:[%s1355_s18 + $0x20] sm:$0xff]  ;;  %v358_v27 = vld [vmem:[%s1355_s18 + $0x30] sm:$0xff] }
  0xe5   : > { %v712_v31 = vmul.f32 %v1178_v23, %v549_v30 }
  0xe7   : > { %v1682_v33 = vsel %vm717_vm7, %v712_v31, %v1573_v55 }
  0xe8   : > { %740 = vmatmul.f32.vlgmr.msra.gmra.mxu3 %v1682_v33 }
  0xe9   : > { %946 = vmatpush.msra.mxu3 %v1371_v4  ;;  %v354_v4 = vld [vmem:[%s1355_s18 + $0x10] sm:$0xff] }
  0xea   : > { %461 = vmatmul.f32.gmra.mxu1 %v354_v4  ;;  %420 = vmatmul.f32.gmra.mxu0 %v354_v4  ;;  %v359_v4 = vld [vmem:[%s1355_s18 + $0x38] sm:$0xff] }
  0xeb   : > { %947 = vmatpush.msra.mxu3 %v1377_v5  ;;  %v459_v5 = vpop.f32.mrf.mxu1 }
  0xec   : > { %v418_v38 = vpop.f32.mrf.mxu0 }
  0xed   : > { %948 = vmatpush.msra.mxu3 %v1388_v8  ;;  %v460_v8 = vadd.f32 %v459_v5, %v1675_v61  ;;  %v419_v39 = vadd.f32 %v418_v38, %v1678_v1 }
  0xef   : > { %949 = vmatpush.msra.mxu3 %v1401_v11  ;;  %v1124_v11 = vmul.f32 -1.442695, %v460_v8 }
  0xf1   : > { %950 = vmatpush.msra.mxu3 %v1414_v15  ;;  %1179 = vpow2.f32 %v1124_v11  ;;  %v858_v11 = vstv %s857_s28 }
  0xf2   : > { %vm859_vm5 = vcmp.gt.s32.totalorder %v1475_v29, %v858_v11 }
  0xf3   : > { %951 = vmatpush.msra.mxu3 %v1427_v18 }
  0xf5   : > { %952 = vmatpush.msra.mxu3 %v1443_v21  ;;  %v784_v21 = vstv %s783_s25 }
  0xf6   : > { %vm785_vm8 = vcmp.gt.s32.totalorder %v1475_v29, %v784_v21 }
  0xf7   : > { %953 = vmatpush.msra.mxu3 %v1456_v24  ;;  %v1180_v15 = vpop.eup %1179  ;;  %v787_v24 = vsel %vm785_vm8, 1, %v1279_v12 }
  0xf8   : > { %v529_v18 = vadd.f32 1.0, %v1180_v15  ;;  %789 = vperm.xlu1 %1171, %v787_v24   ;;  %v861_v15 = vsel %vm859_vm5, 1, %v1279_v12 }
  0xf9   : > { %954 = vmatpush.msra.mxu3 %v1470_v28  ;;  %v821_v28 = vstv %s820_s26  ;;  %863 = vperm.xlu2 %1172, %v861_v15  }
  0xfa   : > { %1181 = vrcp.f32 %v529_v18  ;;  %vm822_vm9 = vcmp.gt.s32.totalorder %v1475_v29, %v821_v28  ;;  %vm556_vm11 = vweird.f32 %v529_v18  ;;  %v562_v44 = vand.u32 2147483648, %v529_v18 }
  0xfb   : > { %955 = vmatpush.msra.mxu3 %v1490_v32  ;;  %v824_v34 = vsel %vm822_vm9, 1, %v1279_v12  ;;  %v560_v46 = vand.u32 2147483647, %v529_v18 }
  0xfd   : > { %956 = vmatpush.msra.mxu3 %v1504_v37  ;;  %vm561_vm14 = vcmp.eq.f32.partialorder %v560_v46, 8.507059e+37 }
  0xff   : > { %957 = vmatpush.msra.mxu3 %v1516_v40  ;;  %v972_v40 = vsel %vm970_vm10, 1, %v1279_v12 }
 0x100   : > { %v1182_v32 = vpop.eup %1181  ;;  %826 = vperm.xlu1 %1171, %v824_v34  }
 0x101   : > { %958 = vmatpush.msra.mxu3 %v1530_v43  ;;  %v552_v35 = vmul.f32 %v1182_v32, %v529_v18  ;;  %vm557_vm12 = vweird.f32 %v1182_v32  ;;  %v895_v18 = vstv %s894_s11 }
 0x102   : > { %vm558_vm13 = vmor %vm556_vm11, %vm557_vm12  ;;  %vm896_vm6 = vcmp.gt.s32.totalorder %v1475_v29, %v895_v18 }
 0x103   : > { %959 = vmatpush.msra.mxu3 %v1545_v47  ;;  %v553_v37 = vsub.f32 1.0, %v552_v35  ;;  %v563_v47 = vor.u32 1.1754944e-38, %v562_v44  ;;  %v898_v24 = vsel %vm896_vm6, 1, %v1279_v12 }
 0x104   : > { %900 = vperm.xlu2 %1172, %v898_v24  }
 0x105   : > { %960 = vmatpush.msra.mxu3 %v1558_v51  ;;  %v554_v41 = vmul.f32 %v1182_v32, %v553_v37  ;;  %v753_v51 = vpop.permute.xlu0 %752 }
 0x106   : > { %vm754_vm15 = vcmp.eq.s32.totalorder %v753_v51, 1 }
 0x107   : > { %961 = vmatpush.msra.mxu3 %v1568_v54  ;;  %v555_v45 = vadd.f32 %v1182_v32, %v554_v41  ;;  %v355_v54 = vld [vmem:[%s1355_s18 + $0x18] sm:$0xff] }
 0x108   : > { %974 = vperm.xlu1 %1171, %v972_v40   ;;  %464 = vmatmul.f32.gmra.mxu1 %v355_v54 }
 0x109   : > { %v559_v48 = vsel %vm558_vm13, %v1182_v32, %v555_v45  ;;  %423 = vmatmul.f32.gmra.mxu0 %v355_v54 }
 0x10a   : > { %v564_v50 = vsel %vm561_vm14, %v563_v47, %v559_v48 }
 0x110   : > { %467 = vmatmul.f32.gmra.mxu1 %v356_v25 }
 0x111   : > { %426 = vmatmul.f32.gmra.mxu0 %v356_v25 }
 0x118   : > { %470 = vmatmul.f32.gmra.mxu1 %v357_v26 }
 0x119   : > { %429 = vmatmul.f32.gmra.mxu0 %v357_v26 }
 0x120   : > { %473 = vmatmul.f32.gmra.mxu1 %v358_v27 }
 0x121   : > { %432 = vmatmul.f32.gmra.mxu0 %v358_v27 }
 0x128   : > { %476 = vmatmul.f32.gmra.mxu1 %v359_v4 }
 0x129   : > { %435 = vmatmul.f32.gmra.mxu0 %v359_v4 }
 0x167   : > { %v462_v55 = vpop.f32.mrf.mxu1  ;;  %v421_v0 = vpop.f32.mrf.mxu0 }
 0x168   : > { %v463_v56 = vadd.f32 %v462_v55, %v1675_v61  ;;  %v422_v2 = vadd.f32 %v421_v0, %v1678_v1 }
 0x16a   : > { %v1125_v57 = vmul.f32 -1.442695, %v463_v56  ;;  %v790_v17 = vpop.permute.xlu1 %789 }
 0x16b   : > { %v741_v42 = vpop.f32.mrf.mxu3  ;;  %vm791_vm4 = vcmp.eq.s32.totalorder %v790_v17, 1 }
 0x16c   : > { %v744_v43 = vadd.f32 %v741_v42, %v419_v39 }
 0x16e   : > { %1183 = vtanh.f32 %v744_v43 }
 0x16f   : > { %1185 = vpow2.f32 %v1125_v57 }
 0x172   : > { %v827_v44 = vpop.permute.xlu1 %826 }
 0x173   : > { %vm828_vm11 = vcmp.eq.s32.totalorder %v827_v44, 1 }
 0x174   : > { %v1184_v49 = vpop.eup %1183 }
 0x175   : > { %v749_v52 = vmul.f32 %v1184_v49, %v564_v50  ;;  %v1186_v58 = vpop.eup %1185 }
 0x176   : > { %v530_v59 = vadd.f32 1.0, %v1186_v58 }
 0x177   : > { %v755_v53 = vsel %vm754_vm15, %v749_v52, %v1682_v33 }
 0x178   : > { %777 = vmatmul.f32.vlgmr.msrb.gmra.mxu2 %v755_v53  ;;  %1187 = vrcp.f32 %v530_v59  ;;  %vm571_vm0 = vweird.f32 %v530_v59  ;;  %v577_v9 = vand.u32 2147483648, %v530_v59  ;;  %v575_v13 = vand.u32 2147483647, %v530_v59 }
 0x17a   : > { %v578_v14 = vor.u32 1.1754944e-38, %v577_v9  ;;  %vm576_vm3 = vcmp.eq.f32.partialorder %v575_v13, 8.507059e+37  ;;  %v864_v9 = vpop.permute.xlu2 %863 }
 0x17e   : > { %v1188_v60 = vpop.eup %1187 }
 0x17f   : > { %v567_v62 = vmul.f32 %v1188_v60, %v530_v59  ;;  %vm572_vm1 = vweird.f32 %v1188_v60 }
 0x180   : > { %vm573_vm2 = vmor %vm571_vm0, %vm572_vm1  ;;  %vm865_vm0 = vcmp.eq.s32.totalorder %v864_v9, 1 }
 0x181   : > { %v568_v63 = vsub.f32 1.0, %v567_v62 }
 0x183   : > { %v569_v3 = vmul.f32 %v1188_v60, %v568_v63 }
 0x185   : > { %v570_v10 = vadd.f32 %v1188_v60, %v569_v3  ;;  %v465_v30 = vpop.f32.mrf.mxu1 }
 0x186   : > { %v466_v31 = vadd.f32 %v465_v30, %v1675_v61  ;;  %v424_v34 = vpop.f32.mrf.mxu0 }
 0x187   : > { %v574_v16 = vsel %vm573_vm2, %v1188_v60, %v570_v10  ;;  %v425_v35 = vadd.f32 %v424_v34, %v1678_v1 }
 0x188   : > { %v579_v20 = vsel %vm576_vm3, %v578_v14, %v574_v16  ;;  %v1126_v33 = vmul.f32 -1.442695, %v466_v31 }
 0x18d   : > { %v468_v47 = vpop.f32.mrf.mxu1 }
 0x18e   : > { %v469_v48 = vadd.f32 %v468_v47, %v1675_v61  ;;  %v427_v49 = vpop.f32.mrf.mxu0 }
 0x18f   : > { %v428_v60 = vadd.f32 %v427_v49, %v1678_v1 }
 0x190   : > { %v1127_v50 = vmul.f32 -1.442695, %v469_v48 }
 0x195   : > { %v471_v17 = vpop.f32.mrf.mxu1 }
 0x196   : > { %v430_v51 = vpop.f32.mrf.mxu0 }
 0x197   : > { %v431_v4 = vadd.f32 %v430_v51, %v1678_v1  ;;  %v938_v51 = vpop.permute.xlu0 %937 }
 0x19d   : > { %v474_v25 = vpop.f32.mrf.mxu1 }
 0x19e   : > { %v1730_v54 = vpop.f32.mrf.mxu0 }
 0x1a5   : > { %v477_v30 = vpop.f32.mrf.mxu1 }
 0x1a6   : > { %v1732_v57 = vpop.f32.mrf.mxu0 }
 0x1fb   : > { %v778_v6 = vpop.f32.mrf.mxu2 }
 0x1fc   : > { %v781_v7 = vadd.f32 %v778_v6, %v422_v2 }
 0x1fe   : > { %1189 = vtanh.f32 %v781_v7 }
 0x1ff   : > { %1191 = vpow2.f32 %v1126_v33 }
 0x204   : > { %v1190_v19 = vpop.eup %1189 }
 0x205   : > { %v786_v22 = vmul.f32 %v1190_v19, %v579_v20  ;;  %v1192_v5 = vpop.eup %1191  ;;  %v472_v19 = vadd.f32 %v471_v17, %v1675_v61 }
 0x206   : > { %v531_v8 = vadd.f32 1.0, %v1192_v5 }
 0x207   : > { %v792_v23 = vsel %vm791_vm4, %v786_v22, %v755_v53  ;;  %v1128_v20 = vmul.f32 -1.442695, %v472_v19 }
 0x208   : > { %814 = vmatmul.f32.vlgmr.msrb.gmra.mxu3 %v792_v23  ;;  %1193 = vrcp.f32 %v531_v8  ;;  %vm586_vm7 = vweird.f32 %v531_v8  ;;  %v592_v39 = vand.u32 2147483648, %v531_v8  ;;  %v590_v41 = vand.u32 2147483647, %v531_v8 }
 0x20a   : > { %v593_v29 = vor.u32 1.1754944e-38, %v592_v39  ;;  %vm591_vm10 = vcmp.eq.f32.partialorder %v590_v41, 8.507059e+37 }
 0x20e   : > { %v1194_v21 = vpop.eup %1193 }
 0x20f   : > { %v582_v28 = vmul.f32 %v1194_v21, %v531_v8  ;;  %vm587_vm8 = vweird.f32 %v1194_v21 }
 0x210   : > { %vm588_vm9 = vmor %vm586_vm7, %vm587_vm8 }
 0x211   : > { %v583_v32 = vsub.f32 1.0, %v582_v28  ;;  %v901_v28 = vpop.permute.xlu2 %900 }
 0x212   : > { %vm902_vm5 = vcmp.eq.s32.totalorder %v901_v28, 1 }
 0x213   : > { %v584_v36 = vmul.f32 %v1194_v21, %v583_v32 }
 0x215   : > { %v585_v40 = vadd.f32 %v1194_v21, %v584_v36 }
 0x217   : > { %v589_v42 = vsel %vm588_vm9, %v1194_v21, %v585_v40 }
 0x218   : > { %v594_v43 = vsel %vm591_vm10, %v593_v29, %v589_v42  ;;  %vm939_vm10 = vcmp.eq.s32.totalorder %v938_v51, 1 }
 0x28b   : > { %v815_v37 = vpop.f32.mrf.mxu3 }
 0x28c   : > { %v818_v38 = vadd.f32 %v815_v37, %v425_v35  ;;  %v475_v37 = vadd.f32 %v474_v25, %v1675_v61 }
 0x28e   : > { %1195 = vtanh.f32 %v818_v38  ;;  %v1129_v38 = vmul.f32 -1.442695, %v475_v37 }
 0x28f   : > { %1197 = vpow2.f32 %v1127_v50 }
 0x294   : > { %v1196_v12 = vpop.eup %1195 }
 0x295   : > { %v823_v45 = vmul.f32 %v1196_v12, %v594_v43  ;;  %v1198_v52 = vpop.eup %1197  ;;  %v434_v43 = vadd.f32 %v1730_v54, %v1678_v1  ;;  %v478_v54 = vadd.f32 %v477_v30, %v1675_v61 }
 0x296   : > { %v532_v53 = vadd.f32 1.0, %v1198_v52 }
 0x297   : > { %v829_v46 = vsel %vm828_vm11, %v823_v45, %v792_v23 }
 0x298   : > { %851 = vmatmul.f32.vlgmr.msrb.gmra.mxu0 %v829_v46  ;;  %1199 = vrcp.f32 %v532_v53  ;;  %vm601_vm12 = vweird.f32 %v532_v53  ;;  %v607_v0 = vand.u32 2147483648, %v532_v53  ;;  %v605_v3 = vand.u32 2147483647, %v532_v53 }
 0x29a   : > { %v608_v6 = vor.u32 1.1754944e-38, %v607_v0  ;;  %vm606_vm15 = vcmp.eq.f32.partialorder %v605_v3, 8.507059e+37  ;;  %v437_v3 = vadd.f32 %v1732_v57, %v1678_v1 }
 0x29e   : > { %v1200_v55 = vpop.eup %1199 }
 0x29f   : > { %v597_v56 = vmul.f32 %v1200_v55, %v532_v53  ;;  %vm602_vm13 = vweird.f32 %v1200_v55 }
 0x2a0   : > { %vm603_vm14 = vmor %vm601_vm12, %vm602_vm13 }
 0x2a1   : > { %v598_v58 = vsub.f32 1.0, %v597_v56 }
 0x2a3   : > { %v599_v59 = vmul.f32 %v1200_v55, %v598_v58  ;;  %v1130_v58 = vmul.f32 -1.442695, %v478_v54 }
 0x2a5   : > { %v600_v2 = vadd.f32 %v1200_v55, %v599_v59 }
 0x2a7   : > { %v604_v7 = vsel %vm603_vm14, %v1200_v55, %v600_v2 }
 0x2a8   : > { %v609_v13 = vsel %vm606_vm15, %v608_v6, %v604_v7 }
 0x315   : > { %v852_v62 = vpop.f32.mrf.mxu0 }
 0x316   : > { %v855_v63 = vadd.f32 %v852_v62, %v428_v60 }
 0x318   : > { %1201 = vtanh.f32 %v855_v63 }
 0x319   : > { %1203 = vpow2.f32 %v1128_v20 }
 0x31e   : > { %v1202_v10 = vpop.eup %1201 }
 0x31f   : > { %v860_v14 = vmul.f32 %v1202_v10, %v609_v13  ;;  %v1204_v22 = vpop.eup %1203 }
 0x320   : > { %v533_v23 = vadd.f32 1.0, %v1204_v22 }
 0x321   : > { %v866_v16 = vsel %vm865_vm0, %v860_v14, %v829_v46 }
 0x322   : > { %888 = vmatmul.f32.vlgmr.msrb.gmra.mxu1 %v866_v16  ;;  %1205 = vrcp.f32 %v533_v23  ;;  %vm616_vm1 = vweird.f32 %v533_v23  ;;  %v622_v11 = vand.u32 2147483648, %v533_v23  ;;  %v620_v18 = vand.u32 2147483647, %v533_v23 }
 0x324   : > { %v623_v21 = vor.u32 1.1754944e-38, %v622_v11  ;;  %vm621_vm4 = vcmp.eq.f32.partialorder %v620_v18, 8.507059e+37 }
 0x328   : > { %v1206_v26 = vpop.eup %1205 }
 0x329   : > { %v612_v27 = vmul.f32 %v1206_v26, %v533_v23  ;;  %vm617_vm2 = vweird.f32 %v1206_v26 }
 0x32a   : > { %vm618_vm3 = vmor %vm616_vm1, %vm617_vm2 }
 0x32b   : > { %v613_v31 = vsub.f32 1.0, %v612_v27 }
 0x32d   : > { %v614_v33 = vmul.f32 %v1206_v26, %v613_v31 }
 0x32f   : > { %v615_v15 = vadd.f32 %v1206_v26, %v614_v33 }
 0x331   : > { %v619_v24 = vsel %vm618_vm3, %v1206_v26, %v615_v15 }
 0x332   : > { %v624_v34 = vsel %vm621_vm4, %v623_v21, %v619_v24 }
 0x39f   : > { %v889_v5 = vpop.f32.mrf.mxu1 }
 0x3a0   : > { %v892_v8 = vadd.f32 %v889_v5, %v431_v4 }
 0x3a2   : > { %1207 = vtanh.f32 %v892_v8 }
 0x3a3   : > { %1209 = vpow2.f32 %v1129_v38 }
 0x3a8   : > { %v1208_v32 = vpop.eup %1207 }
 0x3a9   : > { %v897_v35 = vmul.f32 %v1208_v32, %v624_v34  ;;  %v1210_v39 = vpop.eup %1209 }
 0x3aa   : > { %v534_v40 = vadd.f32 1.0, %v1210_v39 }
 0x3ab   : > { %v903_v36 = vsel %vm902_vm5, %v897_v35, %v866_v16  ;;  %v975_v16 = vpop.permute.xlu1 %974 }
 0x3ac   : > { %925 = vmatmul.f32.vlgmr.msra.gmra.mxu2 %v903_v36  ;;  %1211 = vrcp.f32 %v534_v40  ;;  %vm631_vm6 = vweird.f32 %v534_v40  ;;  %v637_v46 = vand.u32 2147483648, %v534_v40  ;;  %v635_v48 = vand.u32 2147483647, %v534_v40 }
 0x3ad   : > { %vm976_vm15 = vcmp.eq.s32.totalorder %v975_v16, 1 }
 0x3ae   : > { %v638_v49 = vor.u32 1.1754944e-38, %v637_v46  ;;  %vm636_vm9 = vcmp.eq.f32.partialorder %v635_v48, 8.507059e+37 }
 0x3b2   : > { %v1212_v41 = vpop.eup %1211 }
 0x3b3   : > { %v627_v29 = vmul.f32 %v1212_v41, %v534_v40  ;;  %vm632_vm7 = vweird.f32 %v1212_v41 }
 0x3b4   : > { %vm633_vm8 = vmor %vm631_vm6, %vm632_vm7 }
 0x3b5   : > { %v628_v42 = vsub.f32 1.0, %v627_v29 }
 0x3b7   : > { %v629_v12 = vmul.f32 %v1212_v41, %v628_v42 }
 0x3b9   : > { %v630_v47 = vadd.f32 %v1212_v41, %v629_v12 }
 0x3bb   : > { %v634_v50 = vsel %vm633_vm8, %v1212_v41, %v630_v47 }
 0x3bc   : > { %v639_v53 = vsel %vm636_vm9, %v638_v49, %v634_v50 }
 0x42f   : > { %v926_v44 = vpop.f32.mrf.mxu2 }
 0x430   : > { %v929_v45 = vadd.f32 %v926_v44, %v434_v43 }
 0x432   : > { %1213 = vtanh.f32 %v929_v45 }
 0x433   : > { %1215 = vpow2.f32 %v1130_v58 }
 0x438   : > { %v1214_v52 = vpop.eup %1213 }
 0x439   : > { %v934_v55 = vmul.f32 %v1214_v52, %v639_v53  ;;  %v1216_v59 = vpop.eup %1215 }
 0x43a   : > { %v535_v60 = vadd.f32 1.0, %v1216_v59 }
 0x43b   : > { %v940_v56 = vsel %vm939_vm10, %v934_v55, %v903_v36 }
 0x43c   : > { %962 = vmatmul.f32.vlgmr.msra.gmra.mxu3 %v940_v56  ;;  %1217 = vrcp.f32 %v535_v60  ;;  %vm646_vm11 = vweird.f32 %v535_v60  ;;  %v652_v7 = vand.u32 2147483648, %v535_v60  ;;  %v650_v13 = vand.u32 2147483647, %v535_v60 }
 0x43e   : > { %v653_v61 = vor.u32 1.1754944e-38, %v652_v7  ;;  %vm651_vm14 = vcmp.eq.f32.partialorder %v650_v13, 8.507059e+37 }
 0x442   : > { %v1218_v62 = vpop.eup %1217 }
 0x443   : > { %v642_v63 = vmul.f32 %v1218_v62, %v535_v60  ;;  %vm647_vm12 = vweird.f32 %v1218_v62 }
 0x444   : > { %vm648_vm13 = vmor %vm646_vm11, %vm647_vm12 }
 0x445   : > { %v643_v0 = vsub.f32 1.0, %v642_v63 }
 0x447   : > { %v644_v2 = vmul.f32 %v1218_v62, %v643_v0 }
 0x449   : > { %v645_v10 = vadd.f32 %v1218_v62, %v644_v2 }
 0x44b   : > { %v649_v14 = vsel %vm648_vm13, %v1218_v62, %v645_v10 }
 0x44c   : > { %v654_v19 = vsel %vm651_vm14, %v653_v61, %v649_v14 }
 0x4bf   : > { %v963_v6 = vpop.f32.mrf.mxu3 }
 0x4c0   : > { %v966_v9 = vadd.f32 %v963_v6, %v437_v3 }
 0x4c2   : > { %1219 = vtanh.f32 %v966_v9 }
 0x4c8   : > { %v1220_v17 = vpop.eup %1219 }
 0x4c9   : > { %v971_v20 = vmul.f32 %v1220_v17, %v654_v19 }
 0x4cb   : > { %v977_v22 = vsel %vm976_vm15, %v971_v20, %v940_v56 }
 0x4cc   : > { %978 = vst [vmem:[#allocation3] sm:$0xff] %v977_v22 }
 0x4cd PF: > { %p1132_p8 = scmp.ne.s32.totalorder %s1268_s29, 2 }
 0x4cf   : > { %982 = sbr.rel (%p1132_p8) target bundleno = 1397 (0x575), region = 60 }
 0x4d4   : > { %v999_v1 = vld [vmem:[%s1815_s6 + $0x78] sm:$0xff]  ;;  %v998_v57 = vld [vmem:[%s1815_s6 + $0x70] sm:$0xff]  ;;  %v997_v23 = vld [vmem:[%s1815_s6 + $0x68] sm:$0xff] }
 0x4d5   : > { %1004 = vmatpush.msra.mxu0 %v999_v1  ;;  %v996_v25 = vld [vmem:[%s1815_s6 + $0x60] sm:$0xff]  ;;  %v995_v26 = vld [vmem:[%s1815_s6 + $0x58] sm:$0xff]  ;;  %v994_v27 = vld [vmem:[%s1815_s6 + $0x50] sm:$0xff] }
 0x4d6   : > { %v993_v30 = vld [vmem:[%s1815_s6 + $0x48] sm:$0xff]  ;;  %v992_v31 = vld [vmem:[%s1815_s6 + $0x40] sm:$0xff]  ;;  %v991_v33 = vld [vmem:[%s1815_s6 + $0x38] sm:$0xff] }
 0x4d7   : > { %1005 = vmatpush.msra.mxu0 %v998_v57  ;;  %v990_v4 = vld [vmem:[%s1815_s6 + $0x30] sm:$0xff]  ;;  %v989_v5 = vld [vmem:[%s1815_s6 + $0x28] sm:$0xff]  ;;  %v988_v8 = vld [vmem:[%s1815_s6 + $0x20] sm:$0xff] }
 0x4d8   : > { %v987_v11 = vld [vmem:[%s1815_s6 + $0x18] sm:$0xff]  ;;  %v986_v15 = vld [vmem:[%s1815_s6 + $0x10] sm:$0xff]  ;;  %v985_v18 = vld [vmem:[%s1815_s6 + $0x8] sm:$0xff] }
 0x4d9   : > { %1006 = vmatpush.msra.mxu0 %v997_v23  ;;  %v984_v21 = vld [vmem:[%s1815_s6] sm:$0xff] }
 0x4da   : > { %v983_v24 = vld [vmem:[#allocation3] sm:$0xff] }
 0x4db   : > { %1007 = vmatpush.msra.mxu0 %v996_v25  ;;  %v1221_v28 = vld [vmem:[%s1816_s7] ss:$0 sm:$0xff] }
 0x4dd   : > { %1008 = vmatpush.msra.mxu0 %v995_v26 }
 0x4df   : > { %1009 = vmatpush.msra.mxu0 %v994_v27 }
 0x4e1   : > { %1010 = vmatpush.msra.mxu0 %v993_v30 }
 0x4e3   : > { %1011 = vmatpush.msra.mxu0 %v992_v31 }
 0x4e5   : > { %1012 = vmatpush.msra.mxu0 %v991_v33 }
 0x4e7   : > { %1013 = vmatpush.msra.mxu0 %v990_v4 }
 0x4e9   : > { %1014 = vmatpush.msra.mxu0 %v989_v5 }
 0x4eb   : > { %1015 = vmatpush.msra.mxu0 %v988_v8 }
 0x4ed   : > { %1016 = vmatpush.msra.mxu0 %v987_v11 }
 0x4ef   : > { %1017 = vmatpush.msra.mxu0 %v986_v15 }
 0x4f1   : > { %1018 = vmatpush.msra.mxu0 %v985_v18 }
 0x4f3   : > { %1019 = vmatpush.msra.mxu0 %v984_v21 }
 0x4f4   : > { %1020 = vmatmul.f32.vlgmr.msra.gmra.mxu0 %v983_v24 }
 0x571   : > { %v1021_v32 = vpop.f32.mrf.mxu0 }
 0x572   : > { %v1022_v34 = vadd.f32 %v1221_v28, %v1021_v32 }
 0x574   : > { %1024 = vst [vmem:[#allocation6] sm:$0xff] %v1022_v34 }
 0x575 PF: > { %p1141_p9 = scmp.eq.s32.totalorder %s1111_s0, 2  ;;  %s1035_s28 = sshll.u32 %s1817_s8, 4  ;;  %s1036_s28 = int_to_ptr.hbm [resolvable:$true] %s1035_s28 }
 0x576   : > { %s1280_s11 = smov [#allocation6]  }
 0x577   : > { %s1033_s18 = sshll.u32 %s1280_s11, 4  ;;  %s1034_s18 = int_to_ptr.vmem [resolvable:$true] %s1033_s18 }
 0x578   : > { %1138 = dma.vmem_to_hbm [thread:$0]  (%p1141_p9), %s1034_s18, 128, %s1036_s28, [#allocation7]  }
 0x579   : > { %1263 = dma.done.wait (%p1141_p9), [#allocation7], 128  }
 0x57a   : > { %1265 = vsyncadd (%p1141_p9), [#allocation7], 4294967168 }
 0x57b PF: > { %s20_s9 = sadd.s32 1, %s1276_s9   ;;  %s1818_s29 = smov %s1272_s30 }
 0x57c   : > { %p17_p10 = scmp.ge.s32.totalorder %s20_s9, 5   ;;  %s1819_s30 = smov %s1821_s10 }
 0x57e   :  { %19 = sbr.rel (!%p17_p10) target bundleno = 4 (0x4), region = 99 }
 0x583   :  { %1049 = vsyncpa [#allocation7], 1 }
 0x584   :  { %1051 = vsyncpa [#allocation7 + $0x1], 1 }

</bundles_post_ra>
